<compile_context>
chip_gen: v6e
topology: v6e:2x2x1
jax: 0.10.0
libtpu: 0.0.40
codegen_flags: <defaults>
</compile_context>

<pallas_src>
import math
import jax
import jax.numpy as jnp
from jax.experimental import pallas as pl
from jax.experimental.pallas import tpu as pltpu

EPS = 1e-5
LANE = 128  # padded feature width for every layer


def _mlp_relu_kernel(x_ref, wstk_ref, vec_ref, o_ref):
    """Whole MLP forward: 5 matmuls + 4 batchnorms + relus + residual + final relu."""

    def bn(h, g, be):
        # Training-mode BatchNorm1d (biased variance), single-pass stats and
        # folded to one scale/shift:  h*scale + (beta - mu*scale).
        mu = jnp.mean(h, axis=0, keepdims=True)
        m2 = jnp.mean(h * h, axis=0, keepdims=True)           # independent of mu reduce
        var = jnp.maximum(m2 - mu * mu, 0.0)
        scale = g * jax.lax.rsqrt(var + EPS)                   # EUP rsqrt
        return h * scale + (be - mu * scale)

    # Packed per-layer [1,128] vectors. Pre-BN biases b1..b4 were dropped
    # (BN absorbs any per-feature constant shift); only b5 (post-fc5) remains.
    g1, be1 = vec_ref[0:1, :], vec_ref[1:2, :]
    g2, be2 = vec_ref[2:3, :], vec_ref[3:4, :]
    g3, be3 = vec_ref[4:5, :], vec_ref[5:6, :]
    g4, be4 = vec_ref[6:7, :], vec_ref[7:8, :]
    b5 = vec_ref[8:9, :]

    x = x_ref[...]                                             # (B, 128)

    # Weights are pre-transposed to [in, out] and stacked: wstk_ref[i] is fc(i+1).
    # f32 matmuls kept on purpose (kernel is latency/launch-bound, not MXU-bound).
    h = jax.nn.relu(bn(jnp.dot(x, wstk_ref[0], preferred_element_type=jnp.float32), g1, be1))
    h = jax.nn.relu(bn(jnp.dot(h, wstk_ref[1], preferred_element_type=jnp.float32), g2, be2))
    r = jax.nn.relu(bn(jnp.dot(h, wstk_ref[2], preferred_element_type=jnp.float32), g3, be3))
    r = bn(jnp.dot(r, wstk_ref[3], preferred_element_type=jnp.float32), g4, be4)
    h = jax.nn.relu(h + r)                                     # residual + relu
    z = jnp.dot(h, wstk_ref[4], preferred_element_type=jnp.float32) + b5
    o_ref[...] = jax.nn.relu(z)                                # SimpleModel_relu final relu


# ----------------------------------------------------------------------------
# Parameter construction (PyTorch-style layout) and one-time packing.
# ----------------------------------------------------------------------------

def _kaiming_normal(key, out_f, in_f):
    # nn.init.kaiming_normal_ default: fan_in mode, gain=sqrt(2).
    std = math.sqrt(2.0 / in_f)
    return jax.random.normal(key, (out_f, in_f), dtype=jnp.float32) * std


def init_params(key, input_size, output_size=1, embedding_size=100, hidden_size=20):
    """Returns PyTorch-layout params: [w1,b1,g1,be1, ..., w4,b4,g4,be4, w5,b5]."""
    dims = [(embedding_size, input_size),
            (hidden_size, embedding_size),
            (hidden_size, hidden_size),
            (hidden_size, hidden_size),
            (output_size, hidden_size)]
    keys = jax.random.split(key, len(dims))
    params = []
    for i, (out_f, in_f) in enumerate(dims):
        params.append(_kaiming_normal(keys[i], out_f, in_f))            # weight [out,in]
        params.append(jnp.zeros((1, out_f), dtype=jnp.float32))         # bias (zero-init)
        if i < 4:                                                        # BN follows fc1..fc4
            params.append(jnp.ones((1, out_f), dtype=jnp.float32))      # gamma
            params.append(jnp.zeros((1, out_f), dtype=jnp.float32))     # beta
    return params


def _pad_wt(w, in_p=LANE, out_p=LANE):
    """Transpose [out,in] -> [in,out] and zero-pad to (in_p, out_p)."""
    wt = w.T
    return jnp.pad(wt, ((0, in_p - wt.shape[0]), (0, out_p - wt.shape[1])))


def _pad_vec(v, out_p=LANE):
    # Zero-padding is load-bearing for gamma: scale -> 0 in padded lanes keeps
    # padded columns exactly zero through BN.
    return jnp.pad(v, ((0, 0), (0, out_p - v.shape[1])))


def pack_params(params):
    """Pack PyTorch-layout params into (w_stack (5,128,128), vec_slab (16,128))."""
    (w1, b1, g1, be1, w2, b2, g2, be2,
     w3, b3, g3, be3, w4, b4, g4, be4, w5, b5) = params
    del b1, b2, b3, b4  # pre-BN biases are mathematically absorbed by BN

    w_stack = jnp.stack([_pad_wt(w1), _pad_wt(w2), _pad_wt(w3),
                         _pad_wt(w4), _pad_wt(w5)], axis=0)              # (5, 128, 128)

    rows = [g1, be1, g2, be2, g3, be3, g4, be4, b5]                       # 9 rows
    vec = jnp.concatenate([_pad_vec(r) for r in rows], axis=0)           # (9, 128)
    vec = jnp.pad(vec, ((0, 16 - vec.shape[0]), (0, 0)))                 # (16, 128) sublane-aligned
    return w_stack, vec


def make_simple_model_relu(params, output_size=1):
    """Pack params ONCE and return a jitted forward: only x-pad + pallas_call per call."""
    w_stack, vec = pack_params(params)      # hoisted out of the hot path

    vmem = pl.BlockSpec(memory_space=pltpu.MemorySpace.VMEM)

    @jax.jit
    def forward(x):
        B, in_f = x.shape
        x_p = jnp.pad(x.astype(jnp.float32), ((0, 0), (0, LANE - in_f)))  # lane-pad input
        out_padded = pl.pallas_call(
            _mlp_relu_kernel,
            out_shape=jax.ShapeDtypeStruct((B, LANE), jnp.float32),
            in_specs=[vmem, vmem, vmem],
            out_specs=vmem,
        )(x_p, w_stack, vec)
        return out_padded[:, :output_size]

    return forward
    # TODO(synk): for large batch, add a batch grid axis with two-pass BN (or
    # folded eval-mode stats) — training-mode BN couples the whole batch.


# ----------------------------------------------------------------------------
# Plain-JAX reference (unpadded, PyTorch-layout params, two-pass BN).
# ----------------------------------------------------------------------------

def _reference(x, params):
    (w1, b1, g1, be1, w2, b2, g2, be2,
     w3, b3, g3, be3, w4, b4, g4, be4, w5, b5) = params

    def lin(h, w, b):
        return h @ w.T + b

    def bn(h, g, be):
        mu = jnp.mean(h, axis=0, keepdims=True)
        var = jnp.mean((h - mu) ** 2, axis=0, keepdims=True)
        return (h - mu) / jnp.sqrt(var + EPS) * g + be

    h = jax.nn.relu(bn(lin(x, w1, b1), g1, be1))
    h = jax.nn.relu(bn(lin(h, w2, b2), g2, be2))
    r = jax.nn.relu(bn(lin(h, w3, b3), g3, be3))
    r = bn(lin(r, w4, b4), g4, be4)
    h = jax.nn.relu(h + r)
    return jax.nn.relu(lin(h, w5, b5))


if __name__ == "__main__":
    key = jax.random.PRNGKey(0)
    k_x, k_p = jax.random.split(key)

    B, INPUT_SIZE = 8, 16
    x = jax.random.normal(k_x, (B, INPUT_SIZE), dtype=jnp.float32)
    params = init_params(k_p, INPUT_SIZE, output_size=1,
                         embedding_size=100, hidden_size=20)

    forward = make_simple_model_relu(params, output_size=1)   # packs params once
    out = forward(x)
    out = jax.block_until_ready(out)

    ref = _reference(x, params)
    assert out.shape == (B, 1)
    # Slightly looser tolerance than before: single-pass variance (E[h^2]-mu^2)
    # introduces tiny f32 drift vs the two-pass reference.
    assert jnp.allclose(out, ref, atol=1e-4, rtol=1e-4), (out, ref)

    print("KERNEL_OK")
</pallas_src>

<mosaic_0001>
module attributes {stable_mosaic.version = 11 : i64} {
  func.func @_mlp_relu_kernel(%arg0: memref<8x128xf32, #tpu.memory_space<vmem>>, %arg1: memref<5x128x128xf32, #tpu.memory_space<vmem>>, %arg2: memref<16x128xf32, #tpu.memory_space<vmem>>, %arg3: memref<8x128xf32, #tpu.memory_space<vmem>>) attributes {dimension_semantics = [], scalar_prefetch = 0 : i64, scratch_operands = 0 : i64, tpu.core_type = #tpu.core_type<tc>} {
    %c0 = arith.constant 0 : index
    %c0_0 = arith.constant 0 : index
    %0 = vector.load %arg2[%c0, %c0_0] : memref<16x128xf32, #tpu.memory_space<vmem>>, vector<1x128xf32>
    %c1 = arith.constant 1 : index
    %c0_1 = arith.constant 0 : index
    %1 = vector.load %arg2[%c1, %c0_1] : memref<16x128xf32, #tpu.memory_space<vmem>>, vector<1x128xf32>
    %c2 = arith.constant 2 : index
    %c0_2 = arith.constant 0 : index
    %2 = vector.load %arg2[%c2, %c0_2] : memref<16x128xf32, #tpu.memory_space<vmem>>, vector<1x128xf32>
    %c3 = arith.constant 3 : index
    %c0_3 = arith.constant 0 : index
    %3 = vector.load %arg2[%c3, %c0_3] : memref<16x128xf32, #tpu.memory_space<vmem>>, vector<1x128xf32>
    %c4 = arith.constant 4 : index
    %c0_4 = arith.constant 0 : index
    %4 = vector.load %arg2[%c4, %c0_4] : memref<16x128xf32, #tpu.memory_space<vmem>>, vector<1x128xf32>
    %c5 = arith.constant 5 : index
    %c0_5 = arith.constant 0 : index
    %5 = vector.load %arg2[%c5, %c0_5] : memref<16x128xf32, #tpu.memory_space<vmem>>, vector<1x128xf32>
    %c6 = arith.constant 6 : index
    %c0_6 = arith.constant 0 : index
    %6 = vector.load %arg2[%c6, %c0_6] : memref<16x128xf32, #tpu.memory_space<vmem>>, vector<1x128xf32>
    %c7 = arith.constant 7 : index
    %c0_7 = arith.constant 0 : index
    %7 = vector.load %arg2[%c7, %c0_7] : memref<16x128xf32, #tpu.memory_space<vmem>>, vector<1x128xf32>
    %c8 = arith.constant 8 : index
    %c0_8 = arith.constant 0 : index
    %8 = vector.load %arg2[%c8, %c0_8] : memref<16x128xf32, #tpu.memory_space<vmem>>, vector<1x128xf32>
    %c0_9 = arith.constant 0 : index
    %c0_10 = arith.constant 0 : index
    %9 = vector.load %arg0[%c0_9, %c0_10] : memref<8x128xf32, #tpu.memory_space<vmem>>, vector<8x128xf32>
    %c0_11 = arith.constant 0 : index
    %c0_12 = arith.constant 0 : index
    %c0_13 = arith.constant 0 : index
    %10 = vector.load %arg1[%c0_11, %c0_12, %c0_13] : memref<5x128x128xf32, #tpu.memory_space<vmem>>, vector<1x128x128xf32>
    %11 = vector.shape_cast %10 : vector<1x128x128xf32> to vector<128x128xf32>
    %cst = arith.constant dense<0.000000e+00> : vector<8x128xf32>
    %12 = tpu.matmul %9, %11, %cst {dimension_numbers = #tpu.dot_dimension_numbers<[1], [0], [0], [1], [0, 0, 1, 1], [], []>} : vector<8x128xf32>, vector<128x128xf32>, vector<8x128xf32> -> vector<8x128xf32>
    %cst_14 = arith.constant dense<0.000000e+00> : vector<128xf32>
    %13 = vector.multi_reduction <add>, %12, %cst_14 [0] : vector<8x128xf32> to vector<128xf32>
    %14 = vector.shape_cast %13 : vector<128xf32> to vector<1x128xf32>
    %cst_15 = arith.constant 8.000000e+00 : f32
    %15 = vector.broadcast %cst_15 : f32 to vector<1x128xf32>
    %16 = arith.divf %14, %15 : vector<1x128xf32>
    %17 = arith.mulf %12, %12 : vector<8x128xf32>
    %cst_16 = arith.constant dense<0.000000e+00> : vector<128xf32>
    %18 = vector.multi_reduction <add>, %17, %cst_16 [0] : vector<8x128xf32> to vector<128xf32>
    %19 = vector.shape_cast %18 : vector<128xf32> to vector<1x128xf32>
    %cst_17 = arith.constant 8.000000e+00 : f32
    %20 = vector.broadcast %cst_17 : f32 to vector<1x128xf32>
    %21 = arith.divf %19, %20 : vector<1x128xf32>
    %22 = arith.mulf %16, %16 : vector<1x128xf32>
    %23 = arith.subf %21, %22 : vector<1x128xf32>
    %cst_18 = arith.constant 0.000000e+00 : f32
    %24 = vector.broadcast %cst_18 : f32 to vector<1x128xf32>
    %25 = arith.maximumf %23, %24 : vector<1x128xf32>
    %cst_19 = arith.constant 9.99999974E-6 : f32
    %26 = vector.broadcast %cst_19 : f32 to vector<1x128xf32>
    %27 = arith.addf %25, %26 : vector<1x128xf32>
    %28 = math.rsqrt %27 : vector<1x128xf32>
    %29 = arith.mulf %0, %28 : vector<1x128xf32>
    %30 = vector.broadcast %29 : vector<1x128xf32> to vector<8x128xf32>
    %31 = arith.mulf %12, %30 : vector<8x128xf32>
    %32 = arith.mulf %16, %29 : vector<1x128xf32>
    %33 = arith.subf %1, %32 : vector<1x128xf32>
    %34 = vector.broadcast %33 : vector<1x128xf32> to vector<8x128xf32>
    %35 = arith.addf %31, %34 : vector<8x128xf32>
    %cst_20 = arith.constant 0.000000e+00 : f32
    %36 = vector.broadcast %cst_20 : f32 to vector<8x128xf32>
    %37 = arith.maximumf %35, %36 : vector<8x128xf32>
    %c1_21 = arith.constant 1 : index
    %c0_22 = arith.constant 0 : index
    %c0_23 = arith.constant 0 : index
    %38 = vector.load %arg1[%c1_21, %c0_22, %c0_23] : memref<5x128x128xf32, #tpu.memory_space<vmem>>, vector<1x128x128xf32>
    %39 = vector.shape_cast %38 : vector<1x128x128xf32> to vector<128x128xf32>
    %cst_24 = arith.constant dense<0.000000e+00> : vector<8x128xf32>
    %40 = tpu.matmul %37, %39, %cst_24 {dimension_numbers = #tpu.dot_dimension_numbers<[1], [0], [0], [1], [0, 0, 1, 1], [], []>} : vector<8x128xf32>, vector<128x128xf32>, vector<8x128xf32> -> vector<8x128xf32>
    %cst_25 = arith.constant dense<0.000000e+00> : vector<128xf32>
    %41 = vector.multi_reduction <add>, %40, %cst_25 [0] : vector<8x128xf32> to vector<128xf32>
    %42 = vector.shape_cast %41 : vector<128xf32> to vector<1x128xf32>
    %cst_26 = arith.constant 8.000000e+00 : f32
    %43 = vector.broadcast %cst_26 : f32 to vector<1x128xf32>
    %44 = arith.divf %42, %43 : vector<1x128xf32>
    %45 = arith.mulf %40, %40 : vector<8x128xf32>
    %cst_27 = arith.constant dense<0.000000e+00> : vector<128xf32>
    %46 = vector.multi_reduction <add>, %45, %cst_27 [0] : vector<8x128xf32> to vector<128xf32>
    %47 = vector.shape_cast %46 : vector<128xf32> to vector<1x128xf32>
    %cst_28 = arith.constant 8.000000e+00 : f32
    %48 = vector.broadcast %cst_28 : f32 to vector<1x128xf32>
    %49 = arith.divf %47, %48 : vector<1x128xf32>
    %50 = arith.mulf %44, %44 : vector<1x128xf32>
    %51 = arith.subf %49, %50 : vector<1x128xf32>
    %cst_29 = arith.constant 0.000000e+00 : f32
    %52 = vector.broadcast %cst_29 : f32 to vector<1x128xf32>
    %53 = arith.maximumf %51, %52 : vector<1x128xf32>
    %cst_30 = arith.constant 9.99999974E-6 : f32
    %54 = vector.broadcast %cst_30 : f32 to vector<1x128xf32>
    %55 = arith.addf %53, %54 : vector<1x128xf32>
    %56 = math.rsqrt %55 : vector<1x128xf32>
    %57 = arith.mulf %2, %56 : vector<1x128xf32>
    %58 = vector.broadcast %57 : vector<1x128xf32> to vector<8x128xf32>
    %59 = arith.mulf %40, %58 : vector<8x128xf32>
    %60 = arith.mulf %44, %57 : vector<1x128xf32>
    %61 = arith.subf %3, %60 : vector<1x128xf32>
    %62 = vector.broadcast %61 : vector<1x128xf32> to vector<8x128xf32>
    %63 = arith.addf %59, %62 : vector<8x128xf32>
    %cst_31 = arith.constant 0.000000e+00 : f32
    %64 = vector.broadcast %cst_31 : f32 to vector<8x128xf32>
    %65 = arith.maximumf %63, %64 : vector<8x128xf32>
    %c2_32 = arith.constant 2 : index
    %c0_33 = arith.constant 0 : index
    %c0_34 = arith.constant 0 : index
    %66 = vector.load %arg1[%c2_32, %c0_33, %c0_34] : memref<5x128x128xf32, #tpu.memory_space<vmem>>, vector<1x128x128xf32>
    %67 = vector.shape_cast %66 : vector<1x128x128xf32> to vector<128x128xf32>
    %cst_35 = arith.constant dense<0.000000e+00> : vector<8x128xf32>
    %68 = tpu.matmul %65, %67, %cst_35 {dimension_numbers = #tpu.dot_dimension_numbers<[1], [0], [0], [1], [0, 0, 1, 1], [], []>} : vector<8x128xf32>, vector<128x128xf32>, vector<8x128xf32> -> vector<8x128xf32>
    %cst_36 = arith.constant dense<0.000000e+00> : vector<128xf32>
    %69 = vector.multi_reduction <add>, %68, %cst_36 [0] : vector<8x128xf32> to vector<128xf32>
    %70 = vector.shape_cast %69 : vector<128xf32> to vector<1x128xf32>
    %cst_37 = arith.constant 8.000000e+00 : f32
    %71 = vector.broadcast %cst_37 : f32 to vector<1x128xf32>
    %72 = arith.divf %70, %71 : vector<1x128xf32>
    %73 = arith.mulf %68, %68 : vector<8x128xf32>
    %cst_38 = arith.constant dense<0.000000e+00> : vector<128xf32>
    %74 = vector.multi_reduction <add>, %73, %cst_38 [0] : vector<8x128xf32> to vector<128xf32>
    %75 = vector.shape_cast %74 : vector<128xf32> to vector<1x128xf32>
    %cst_39 = arith.constant 8.000000e+00 : f32
    %76 = vector.broadcast %cst_39 : f32 to vector<1x128xf32>
    %77 = arith.divf %75, %76 : vector<1x128xf32>
    %78 = arith.mulf %72, %72 : vector<1x128xf32>
    %79 = arith.subf %77, %78 : vector<1x128xf32>
    %cst_40 = arith.constant 0.000000e+00 : f32
    %80 = vector.broadcast %cst_40 : f32 to vector<1x128xf32>
    %81 = arith.maximumf %79, %80 : vector<1x128xf32>
    %cst_41 = arith.constant 9.99999974E-6 : f32
    %82 = vector.broadcast %cst_41 : f32 to vector<1x128xf32>
    %83 = arith.addf %81, %82 : vector<1x128xf32>
    %84 = math.rsqrt %83 : vector<1x128xf32>
    %85 = arith.mulf %4, %84 : vector<1x128xf32>
    %86 = vector.broadcast %85 : vector<1x128xf32> to vector<8x128xf32>
    %87 = arith.mulf %68, %86 : vector<8x128xf32>
    %88 = arith.mulf %72, %85 : vector<1x128xf32>
    %89 = arith.subf %5, %88 : vector<1x128xf32>
    %90 = vector.broadcast %89 : vector<1x128xf32> to vector<8x128xf32>
    %91 = arith.addf %87, %90 : vector<8x128xf32>
    %cst_42 = arith.constant 0.000000e+00 : f32
    %92 = vector.broadcast %cst_42 : f32 to vector<8x128xf32>
    %93 = arith.maximumf %91, %92 : vector<8x128xf32>
    %c3_43 = arith.constant 3 : index
    %c0_44 = arith.constant 0 : index
    %c0_45 = arith.constant 0 : index
    %94 = vector.load %arg1[%c3_43, %c0_44, %c0_45] : memref<5x128x128xf32, #tpu.memory_space<vmem>>, vector<1x128x128xf32>
    %95 = vector.shape_cast %94 : vector<1x128x128xf32> to vector<128x128xf32>
    %cst_46 = arith.constant dense<0.000000e+00> : vector<8x128xf32>
    %96 = tpu.matmul %93, %95, %cst_46 {dimension_numbers = #tpu.dot_dimension_numbers<[1], [0], [0], [1], [0, 0, 1, 1], [], []>} : vector<8x128xf32>, vector<128x128xf32>, vector<8x128xf32> -> vector<8x128xf32>
    %cst_47 = arith.constant dense<0.000000e+00> : vector<128xf32>
    %97 = vector.multi_reduction <add>, %96, %cst_47 [0] : vector<8x128xf32> to vector<128xf32>
    %98 = vector.shape_cast %97 : vector<128xf32> to vector<1x128xf32>
    %cst_48 = arith.constant 8.000000e+00 : f32
    %99 = vector.broadcast %cst_48 : f32 to vector<1x128xf32>
    %100 = arith.divf %98, %99 : vector<1x128xf32>
    %101 = arith.mulf %96, %96 : vector<8x128xf32>
    %cst_49 = arith.constant dense<0.000000e+00> : vector<128xf32>
    %102 = vector.multi_reduction <add>, %101, %cst_49 [0] : vector<8x128xf32> to vector<128xf32>
    %103 = vector.shape_cast %102 : vector<128xf32> to vector<1x128xf32>
    %cst_50 = arith.constant 8.000000e+00 : f32
    %104 = vector.broadcast %cst_50 : f32 to vector<1x128xf32>
    %105 = arith.divf %103, %104 : vector<1x128xf32>
    %106 = arith.mulf %100, %100 : vector<1x128xf32>
    %107 = arith.subf %105, %106 : vector<1x128xf32>
    %cst_51 = arith.constant 0.000000e+00 : f32
    %108 = vector.broadcast %cst_51 : f32 to vector<1x128xf32>
    %109 = arith.maximumf %107, %108 : vector<1x128xf32>
    %cst_52 = arith.constant 9.99999974E-6 : f32
    %110 = vector.broadcast %cst_52 : f32 to vector<1x128xf32>
    %111 = arith.addf %109, %110 : vector<1x128xf32>
    %112 = math.rsqrt %111 : vector<1x128xf32>
    %113 = arith.mulf %6, %112 : vector<1x128xf32>
    %114 = vector.broadcast %113 : vector<1x128xf32> to vector<8x128xf32>
    %115 = arith.mulf %96, %114 : vector<8x128xf32>
    %116 = arith.mulf %100, %113 : vector<1x128xf32>
    %117 = arith.subf %7, %116 : vector<1x128xf32>
    %118 = vector.broadcast %117 : vector<1x128xf32> to vector<8x128xf32>
    %119 = arith.addf %115, %118 : vector<8x128xf32>
    %120 = arith.addf %65, %119 : vector<8x128xf32>
    %cst_53 = arith.constant 0.000000e+00 : f32
    %121 = vector.broadcast %cst_53 : f32 to vector<8x128xf32>
    %122 = arith.maximumf %120, %121 : vector<8x128xf32>
    %c4_54 = arith.constant 4 : index
    %c0_55 = arith.constant 0 : index
    %c0_56 = arith.constant 0 : index
    %123 = vector.load %arg1[%c4_54, %c0_55, %c0_56] : memref<5x128x128xf32, #tpu.memory_space<vmem>>, vector<1x128x128xf32>
    %124 = vector.shape_cast %123 : vector<1x128x128xf32> to vector<128x128xf32>
    %cst_57 = arith.constant dense<0.000000e+00> : vector<8x128xf32>
    %125 = tpu.matmul %122, %124, %cst_57 {dimension_numbers = #tpu.dot_dimension_numbers<[1], [0], [0], [1], [0, 0, 1, 1], [], []>} : vector<8x128xf32>, vector<128x128xf32>, vector<8x128xf32> -> vector<8x128xf32>
    %126 = vector.broadcast %8 : vector<1x128xf32> to vector<8x128xf32>
    %127 = arith.addf %125, %126 : vector<8x128xf32>
    %cst_58 = arith.constant 0.000000e+00 : f32
    %128 = vector.broadcast %cst_58 : f32 to vector<8x128xf32>
    %129 = arith.maximumf %127, %128 : vector<8x128xf32>
    %c0_59 = arith.constant 0 : index
    %c0_60 = arith.constant 0 : index
    %130 = vector.load %arg3[%c0_59, %c0_60] : memref<8x128xf32, #tpu.memory_space<vmem>>, vector<8x128xf32>
    tpu.vector_store %arg3[%c0_59, %c0_60], %129 {strides = array<i32>} : memref<8x128xf32, #tpu.memory_space<vmem>>, vector<8x128xf32>,
    return
  }
}

</mosaic_0001>

<bundles_post_ra>
// kernel: forward.1
= control target key start
LH: loop header
LB: loop body
LE: loop exit
PB: predicated region body
PF: predicated region fallthrough
CT: control target
= control target key end

     0   :  { %8 = vsyncpa [#allocation3], 0  ;;  %s917_s12 = smov [#allocation2]   ;;  %s1085_s0 = inlined_call_operand.vmem [shape: f32[8,128], index: 0, kind: input, shape index: {}]   ;;  %s1086_s1 = inlined_call_operand.hbm [shape: f32[5,128,128], index: 1, kind: input, shape index: {}]   ;;  %s1087_s2 = inlined_call_operand.vmem [shape: f32[16,128], index: 2, kind: input, shape index: {}]   ;;  %s1088_s3 = inlined_call_operand.vmem [shape: f32[8,128], index: 3, kind: output, shape index: {}]  }
   0x1   :  { %s16_s13 = sshll.u32 %s917_s12, 4  ;;  %s17_s13 = int_to_ptr.vmem [resolvable:$true] %s16_s13 }
   0x2   :  { %s903_s14 = scalar_lea.vmem %s17_s13, 10240  ;;  %p908_p1 = scmp.lt.s32.totalorder %s17_s13, %s17_s13 }
   0x3   :  { %p904_p0 = scmp.ne.s32.totalorder %s17_s13, %s903_s14  ;;  %p909_p2 = scmp.lt.s32.totalorder %s903_s14, %s903_s14 }
   0x5   :  { %p910_p3 = por %p909_p2, %p908_p1 }
   0x7   :  { %p911_p4 = pnand %p910_p3, %p904_p0 }
   0x9   :  { %914 = shalt.err (!%p911_p4)
}
   0xa   :  { %s918_s15 = smov 128   ;;  %s919_s16 = smov 8  }
   0xb   :  { %22 = dma.hbm_to_vmem [thread:$0]  %s1086_s1, 10240, %s17_s13, [#allocation3], %s918_s15, %s918_s15, %s919_s16  }
   0xc   :  { %915 = dma.done.wait [#allocation3], 10240  }
   0xd   :  { %916 = vsyncadd [#allocation3], 4294957056  ;;  %v920_v0 = vmov 0.0   ;;  %vm921_vm0 = vmmov 0   ;;  %v53_v1 = vld [vmem:[#allocation2 + $0x78] sm:$0xff]  ;;  %v52_v2 = vld [vmem:[#allocation2 + $0x70] sm:$0xff]  ;;  %v146_v55 = vlaneseq }
   0xe   :  { %707 = vmatprep.subr.mxu0 %v920_v0  ;;  %739 = vmatprep.mubr.msk.f32.mxu0 %vm921_vm0, %v920_v0  ;;  %v51_v3 = vld [vmem:[#allocation2 + $0x68] sm:$0xff]  ;;  %v50_v4 = vld [vmem:[#allocation2 + $0x60] sm:$0xff]  ;;  %v49_v5 = vld [vmem:[#allocation2 + $0x58] sm:$0xff] }
   0xf   :  { %742 = vmatprep.subr.mxu1 %v920_v0  ;;  %774 = vmatprep.mubr.msk.f32.mxu1 %vm921_vm0, %v920_v0  ;;  %v48_v6 = vld [vmem:[#allocation2 + $0x50] sm:$0xff]  ;;  %v47_v7 = vld [vmem:[#allocation2 + $0x48] sm:$0xff]  ;;  %v46_v8 = vld [vmem:[#allocation2 + $0x40] sm:$0xff]  ;;  %v147_v56 = vshrl.u32 %v146_v55, 7 }
  0x10   :  { %708 = vmatpush3.msra.mxu0 %v53_v1  ;;  %v45_v9 = vld [vmem:[#allocation2 + $0x38] sm:$0xff]  ;;  %v44_v10 = vld [vmem:[#allocation2 + $0x30] sm:$0xff]  ;;  %v43_v11 = vld [vmem:[#allocation2 + $0x28] sm:$0xff] }
  0x11   :  { %709 = vmatprep.subr.mxu0 %v920_v0  ;;  %v42_v12 = vld [vmem:[#allocation2 + $0x20] sm:$0xff]  ;;  %v41_v13 = vld [vmem:[#allocation2 + $0x18] sm:$0xff]  ;;  %v40_v14 = vld [vmem:[#allocation2 + $0x10] sm:$0xff]  ;;  %v991_v58 = vsub.s32 0, %v147_v56 }
  0x12   :  { %710 = vmatpush3.msra.mxu0 %v52_v2  ;;  %v39_v15 = vld [vmem:[#allocation2 + $0x8] sm:$0xff]  ;;  %v38_v16 = vld [vmem:[#allocation2] sm:$0xff]  ;;  %v175_v18 = vld [vmem:[#allocation2 + $0xf8] sm:$0xff] }
  0x13   :  { %711 = vmatprep.subr.mxu0 %v920_v0  ;;  %v37_v17 = vld [vmem:[%s1085_s0] sm:$0xff]  ;;  %743 = vmatpush3.msra.mxu1 %v175_v18  ;;  %v174_v19 = vld [vmem:[#allocation2 + $0xf0] sm:$0xff]  ;;  %v173_v20 = vld [vmem:[#allocation2 + $0xe8] sm:$0xff] }
  0x14   :  { %712 = vmatpush3.msra.mxu0 %v51_v3  ;;  %744 = vmatprep.subr.mxu1 %v920_v0  ;;  %v172_v21 = vld [vmem:[#allocation2 + $0xe0] sm:$0xff]  ;;  %v171_v22 = vld [vmem:[#allocation2 + $0xd8] sm:$0xff]  ;;  %v170_v23 = vld [vmem:[#allocation2 + $0xd0] sm:$0xff] }
  0x15   :  { %713 = vmatprep.subr.mxu0 %v920_v0  ;;  %745 = vmatpush3.msra.mxu1 %v174_v19  ;;  %v169_v24 = vld [vmem:[#allocation2 + $0xc8] sm:$0xff]  ;;  %v168_v25 = vld [vmem:[#allocation2 + $0xc0] sm:$0xff]  ;;  %v167_v26 = vld [vmem:[#allocation2 + $0xb8] sm:$0xff] }
  0x16   :  { %714 = vmatpush3.msra.mxu0 %v50_v4  ;;  %746 = vmatprep.subr.mxu1 %v920_v0  ;;  %v166_v27 = vld [vmem:[#allocation2 + $0xb0] sm:$0xff]  ;;  %v165_v28 = vld [vmem:[#allocation2 + $0xa8] sm:$0xff]  ;;  %v164_v29 = vld [vmem:[#allocation2 + $0xa0] sm:$0xff] }
  0x17   :  { %715 = vmatprep.subr.mxu0 %v920_v0  ;;  %747 = vmatpush3.msra.mxu1 %v173_v20  ;;  %v163_v30 = vld [vmem:[#allocation2 + $0x98] sm:$0xff]  ;;  %v162_v31 = vld [vmem:[#allocation2 + $0x90] sm:$0xff]  ;;  %v161_v32 = vld [vmem:[#allocation2 + $0x88] sm:$0xff] }
  0x18   :  { %716 = vmatpush3.msra.mxu0 %v49_v5  ;;  %748 = vmatprep.subr.mxu1 %v920_v0  ;;  %v160_v33 = vld [vmem:[#allocation2 + $0x80] sm:$0xff]  ;;  %v284_v18 = vld [vmem:[#allocation2 + $0x118] sm:$0xff]  ;;  %v283_v19 = vld [vmem:[#allocation2 + $0x110] sm:$0xff] }
  0x19   :  { %717 = vmatprep.subr.mxu0 %v920_v0  ;;  %749 = vmatpush3.msra.mxu1 %v172_v21  ;;  %v28_v57 = vld [vmem:[%s1087_s2] sm:$0x1]  ;;  %v29_v61 = vld [vmem:[%s1087_s2 + $0x1] sm:$0x1]  ;;  %v282_v20 = vld [vmem:[#allocation2 + $0x108] sm:$0xff] }
  0x1a   :  { %718 = vmatpush3.msra.mxu0 %v48_v6  ;;  %750 = vmatprep.subr.mxu1 %v920_v0  ;;  %v296_v6 = vld [vmem:[#allocation2 + $0x178] sm:$0xff]  ;;  %v281_v21 = vld [vmem:[#allocation2 + $0x100] sm:$0xff]  ;;  %v416_v55 = vld [vmem:[#allocation2 + $0x1f0] sm:$0xff] }
  0x1b   :  { %719 = vmatprep.subr.mxu0 %v920_v0  ;;  %751 = vmatpush3.msra.mxu1 %v171_v22  ;;  %v415_v56 = vld [vmem:[#allocation2 + $0x1e8] sm:$0xff] }
  0x1c   :  { %720 = vmatpush3.msra.mxu0 %v47_v7  ;;  %752 = vmatprep.subr.mxu1 %v920_v0  ;;  %v295_v7 = vld [vmem:[#allocation2 + $0x170] sm:$0xff] }
  0x1d   :  { %721 = vmatprep.subr.mxu0 %v920_v0  ;;  %753 = vmatpush3.msra.mxu1 %v170_v23 }
  0x1e   :  { %722 = vmatpush3.msra.mxu0 %v46_v8  ;;  %754 = vmatprep.subr.mxu1 %v920_v0  ;;  %v294_v8 = vld [vmem:[#allocation2 + $0x168] sm:$0xff] }
  0x1f   :  { %723 = vmatprep.subr.mxu0 %v920_v0  ;;  %755 = vmatpush3.msra.mxu1 %v169_v24 }
  0x20   :  { %724 = vmatpush3.msra.mxu0 %v45_v9  ;;  %756 = vmatprep.subr.mxu1 %v920_v0  ;;  %v293_v9 = vld [vmem:[#allocation2 + $0x160] sm:$0xff] }
  0x21   :  { %725 = vmatprep.subr.mxu0 %v920_v0  ;;  %757 = vmatpush3.msra.mxu1 %v168_v25 }
  0x22   :  { %726 = vmatpush3.msra.mxu0 %v44_v10  ;;  %758 = vmatprep.subr.mxu1 %v920_v0  ;;  %v292_v10 = vld [vmem:[#allocation2 + $0x158] sm:$0xff] }
  0x23   :  { %727 = vmatprep.subr.mxu0 %v920_v0  ;;  %759 = vmatpush3.msra.mxu1 %v167_v26 }
  0x24   :  { %728 = vmatpush3.msra.mxu0 %v43_v11  ;;  %760 = vmatprep.subr.mxu1 %v920_v0  ;;  %v291_v11 = vld [vmem:[#allocation2 + $0x150] sm:$0xff] }
  0x25   :  { %729 = vmatprep.subr.mxu0 %v920_v0  ;;  %761 = vmatpush3.msra.mxu1 %v166_v27 }
  0x26   :  { %730 = vmatpush3.msra.mxu0 %v42_v12  ;;  %762 = vmatprep.subr.mxu1 %v920_v0  ;;  %v290_v12 = vld [vmem:[#allocation2 + $0x148] sm:$0xff] }
  0x27   :  { %731 = vmatprep.subr.mxu0 %v920_v0  ;;  %763 = vmatpush3.msra.mxu1 %v165_v28 }
  0x28   :  { %732 = vmatpush3.msra.mxu0 %v41_v13  ;;  %764 = vmatprep.subr.mxu1 %v920_v0  ;;  %v289_v13 = vld [vmem:[#allocation2 + $0x140] sm:$0xff] }
  0x29   :  { %733 = vmatprep.subr.mxu0 %v920_v0  ;;  %765 = vmatpush3.msra.mxu1 %v164_v29 }
  0x2a   :  { %734 = vmatpush3.msra.mxu0 %v40_v14  ;;  %766 = vmatprep.subr.mxu1 %v920_v0  ;;  %v288_v14 = vld [vmem:[#allocation2 + $0x138] sm:$0xff] }
  0x2b   :  { %735 = vmatprep.subr.mxu0 %v920_v0  ;;  %767 = vmatpush3.msra.mxu1 %v163_v30 }
  0x2c   :  { %736 = vmatpush3.msra.mxu0 %v39_v15  ;;  %768 = vmatprep.subr.mxu1 %v920_v0  ;;  %v287_v15 = vld [vmem:[#allocation2 + $0x130] sm:$0xff] }
  0x2d   :  { %737 = vmatprep.subr.mxu0 %v920_v0  ;;  %769 = vmatpush3.msra.mxu1 %v162_v31 }
  0x2e   :  { %738 = vmatpush3.msra.mxu0 %v38_v16  ;;  %770 = vmatprep.subr.mxu1 %v920_v0  ;;  %v286_v16 = vld [vmem:[#allocation2 + $0x128] sm:$0xff] }
  0x2f   :  { %740 = vmatmul.mubr.f32.vlgmr.msra.gmra.mxu0 %v37_v17  ;;  %777 = vmatprep.subr.mxu0 %v920_v0  ;;  %v285_v17 = vld [vmem:[#allocation2 + $0x120] sm:$0xff] }
  0x30   :  { %809 = vmatprep.mubr.msk.f32.mxu0 %vm921_vm0, %v920_v0  ;;  %771 = vmatpush3.msra.mxu1 %v161_v32 }
  0x31   :  { %772 = vmatprep.subr.mxu1 %v920_v0  ;;  %778 = vmatpush3.msra.mxu0 %v296_v6  ;;  %v403_v6 = vld [vmem:[#allocation2 + $0x188] sm:$0xff] }
  0x32   :  { %773 = vmatpush3.msra.mxu1 %v160_v33  ;;  %779 = vmatprep.subr.mxu0 %v920_v0 }
  0x33   :  { %812 = vmatprep.subr.mxu1 %v920_v0  ;;  %780 = vmatpush3.msra.mxu0 %v295_v7  ;;  %v402_v7 = vld [vmem:[#allocation2 + $0x180] sm:$0xff] }
  0x34   :  { %781 = vmatprep.subr.mxu0 %v920_v0 }
  0x35   :  { %782 = vmatpush3.msra.mxu0 %v294_v8 }
  0x36   :  { %783 = vmatprep.subr.mxu0 %v920_v0 }
  0x37   :  { %784 = vmatpush3.msra.mxu0 %v293_v9 }
  0x38   :  { %785 = vmatprep.subr.mxu0 %v920_v0 }
  0x39   :  { %786 = vmatpush3.msra.mxu0 %v292_v10 }
  0x3a   :  { %787 = vmatprep.subr.mxu0 %v920_v0 }
  0x3b   :  { %788 = vmatpush3.msra.mxu0 %v291_v11 }
  0x3c   :  { %789 = vmatprep.subr.mxu0 %v920_v0 }
  0x3d   :  { %790 = vmatpush3.msra.mxu0 %v290_v12 }
  0x3e   :  { %791 = vmatprep.subr.mxu0 %v920_v0 }
  0x3f   :  { %792 = vmatpush3.msra.mxu0 %v289_v13 }
  0x40   :  { %793 = vmatprep.subr.mxu0 %v920_v0 }
  0x41   :  { %794 = vmatpush3.msra.mxu0 %v288_v14 }
  0x42   :  { %795 = vmatprep.subr.mxu0 %v920_v0 }
  0x43   :  { %796 = vmatpush3.msra.mxu0 %v287_v15 }
  0x44   :  { %797 = vmatprep.subr.mxu0 %v920_v0 }
  0x45   :  { %798 = vmatpush3.msra.mxu0 %v286_v16 }
  0x46   :  { %799 = vmatprep.subr.mxu0 %v920_v0 }
  0x47   :  { %800 = vmatpush3.msra.mxu0 %v285_v17 }
  0x48   :  { %801 = vmatprep.subr.mxu0 %v920_v0 }
  0x49   :  { %802 = vmatpush3.msra.mxu0 %v284_v18 }
  0x4a   :  { %803 = vmatprep.subr.mxu0 %v920_v0 }
  0x4b   :  { %804 = vmatpush3.msra.mxu0 %v283_v19 }
  0x4c   :  { %805 = vmatprep.subr.mxu0 %v920_v0 }
  0x4d   :  { %806 = vmatpush3.msra.mxu0 %v282_v20 }
  0x4e   :  { %807 = vmatprep.subr.mxu0 %v920_v0 }
  0x4f   :  { %808 = vmatpush3.msra.mxu0 %v281_v21 }
  0x50   :  { %847 = vmatprep.subr.mxu0 %v920_v0 }
  0xef   :  { %v120_v34 = vpop.f32.mrf.mxu0 }
  0xf0   :  { %v124_v35 = vrot.slane %v120_v34, 4  ;;  %v132_v36 = vmul.f32 %v120_v34, %v120_v34 }
  0xf1   :  { %v741_v37 = vpop.f32.mrf.mxu0 }
  0xf2   :  { %v125_v38 = vadd.f32 %v124_v35, %v120_v34  ;;  %v133_v39 = vrot.slane %v132_v36, 4 }
  0xf4   :  { %v126_v40 = vrot.slane %v125_v38, 2  ;;  %v134_v41 = vadd.f32 %v133_v39, %v132_v36 }
  0xf6   :  { %v127_v42 = vadd.f32 %v126_v40, %v125_v38  ;;  %v135_v43 = vrot.slane %v134_v41, 2 }
  0xf8   :  { %v128_v44 = vrot.slane %v127_v42, 1  ;;  %v136_v45 = vadd.f32 %v135_v43, %v134_v41  ;;  %v30_v43 = vld [vmem:[%s1087_s2 + $0x2] sm:$0x1] }
  0xfa   :  { %v129_v46 = vadd.f32 %v128_v44, %v127_v42  ;;  %v137_v47 = vrot.slane %v136_v45, 1 }
  0xfc   :  { %v131_v48 = vmul.f32 0.125, %v129_v46  ;;  %v138_v49 = vadd.f32 %v137_v47, %v136_v45  ;;  %v31_v46 = vld [vmem:[%s1087_s2 + $0x3] sm:$0x1] }
  0xfe   :  { %v139_v50 = vmul.f32 0.125, %v138_v49  ;;  %v140_v51 = vmul.f32 %v131_v48, %v131_v48 }
 0x100   :  { %v141_v52 = vsub.f32 %v139_v50, %v140_v51 }
 0x102   :  { %v142_v53 = vmax.f32 %v141_v52, 0.0 }
 0x104   :  { %v143_v54 = vadd.f32 1e-05, %v142_v53 }
 0x106   :  { %887 = vrsqrt.f32 %v143_v54  ;;  %v417_v54 = vld [vmem:[#allocation2 + $0x1f8] sm:$0xff] }
 0x113   :  { %v888_v59 = vpop.eup %887 }
 0x114   :  { %v145_v60 = vmul.f32 %v888_v59, %v28_v57  ;;  %v414_v57 = vld [vmem:[#allocation2 + $0x1e0] sm:$0xff]  ;;  %v413_v59 = vld [vmem:[#allocation2 + $0x1d8] sm:$0xff] }
 0x116   :  { %v149_v62 = vrot.slane %v145_v60, %v991_v58  ;;  %v151_v63 = vmul.f32 %v145_v60, %v131_v48  ;;  %v412_v60 = vld [vmem:[#allocation2 + $0x1d0] sm:$0xff] }
 0x118   :  { %v152_v1 = vsub.f32 %v29_v61, %v151_v63  ;;  %v150_v2 = vmul.f32 %v149_v62, %v120_v34  ;;  %v411_v61 = vld [vmem:[#allocation2 + $0x1c8] sm:$0xff]  ;;  %v410_v62 = vld [vmem:[#allocation2 + $0x1c0] sm:$0xff]  ;;  %v409_v63 = vld [vmem:[#allocation2 + $0x1b8] sm:$0xff] }
 0x11a   :  { %v156_v3 = vrot.slane %v152_v1, %v991_v58  ;;  %v408_v1 = vld [vmem:[#allocation2 + $0x1b0] sm:$0xff] }
 0x11c   :  { %v157_v4 = vadd.f32 %v156_v3, %v150_v2  ;;  %v407_v2 = vld [vmem:[#allocation2 + $0x1a8] sm:$0xff]  ;;  %v406_v3 = vld [vmem:[#allocation2 + $0x1a0] sm:$0xff] }
 0x11e   :  { %v158_v5 = vmax.f32 %v157_v4, 0.0  ;;  %v405_v4 = vld [vmem:[#allocation2 + $0x198] sm:$0xff] }
 0x120   :  { %775 = vmatmul.mubr.f32.vlgmr.msra.gmra.mxu1 %v158_v5  ;;  %v404_v5 = vld [vmem:[#allocation2 + $0x190] sm:$0xff] }
 0x121   :  { %844 = vmatprep.mubr.msk.f32.mxu1 %vm921_vm0, %v920_v0  ;;  %813 = vmatpush3.msra.mxu1 %v417_v54  ;;  %v527_v54 = vld [vmem:[#allocation2 + $0x218] sm:$0xff] }
 0x122   :  { %814 = vmatprep.subr.mxu1 %v920_v0 }
 0x123   :  { %815 = vmatpush3.msra.mxu1 %v416_v55  ;;  %v526_v55 = vld [vmem:[#allocation2 + $0x210] sm:$0xff] }
 0x124   :  { %816 = vmatprep.subr.mxu1 %v920_v0 }
 0x125   :  { %817 = vmatpush3.msra.mxu1 %v415_v56  ;;  %v525_v56 = vld [vmem:[#allocation2 + $0x208] sm:$0xff] }
 0x126   :  { %818 = vmatprep.subr.mxu1 %v920_v0 }
 0x127   :  { %819 = vmatpush3.msra.mxu1 %v414_v57  ;;  %v524_v57 = vld [vmem:[#allocation2 + $0x200] sm:$0xff] }
 0x128   :  { %820 = vmatprep.subr.mxu1 %v920_v0 }
 0x129   :  { %821 = vmatpush3.msra.mxu1 %v413_v59 }
 0x12a   :  { %822 = vmatprep.subr.mxu1 %v920_v0 }
 0x12b   :  { %823 = vmatpush3.msra.mxu1 %v412_v60 }
 0x12c   :  { %824 = vmatprep.subr.mxu1 %v920_v0 }
 0x12d   :  { %825 = vmatpush3.msra.mxu1 %v411_v61 }
 0x12e   :  { %826 = vmatprep.subr.mxu1 %v920_v0 }
 0x12f   :  { %827 = vmatpush3.msra.mxu1 %v410_v62 }
 0x130   :  { %828 = vmatprep.subr.mxu1 %v920_v0 }
 0x131   :  { %829 = vmatpush3.msra.mxu1 %v409_v63 }
 0x132   :  { %830 = vmatprep.subr.mxu1 %v920_v0 }
 0x133   :  { %831 = vmatpush3.msra.mxu1 %v408_v1 }
 0x134   :  { %832 = vmatprep.subr.mxu1 %v920_v0 }
 0x135   :  { %833 = vmatpush3.msra.mxu1 %v407_v2 }
 0x136   :  { %834 = vmatprep.subr.mxu1 %v920_v0 }
 0x137   :  { %835 = vmatpush3.msra.mxu1 %v406_v3 }
 0x138   :  { %836 = vmatprep.subr.mxu1 %v920_v0 }
 0x139   :  { %837 = vmatpush3.msra.mxu1 %v405_v4 }
 0x13a   :  { %838 = vmatprep.subr.mxu1 %v920_v0 }
 0x13b   :  { %839 = vmatpush3.msra.mxu1 %v404_v5 }
 0x13c   :  { %840 = vmatprep.subr.mxu1 %v920_v0 }
 0x13d   :  { %841 = vmatpush3.msra.mxu1 %v403_v6 }
 0x13e   :  { %842 = vmatprep.subr.mxu1 %v920_v0 }
 0x13f   :  { %843 = vmatpush3.msra.mxu1 %v402_v7 }
 0x1e0   :  { %v242_v22 = vpop.f32.mrf.mxu1 }
 0x1e1   :  { %v246_v23 = vrot.slane %v242_v22, 4  ;;  %v253_v24 = vmul.f32 %v242_v22, %v242_v22 }
 0x1e2   :  { %v776_v25 = vpop.f32.mrf.mxu1 }
 0x1e3   :  { %v247_v26 = vadd.f32 %v246_v23, %v242_v22  ;;  %v254_v27 = vrot.slane %v253_v24, 4 }
 0x1e5   :  { %v248_v28 = vrot.slane %v247_v26, 2  ;;  %v255_v29 = vadd.f32 %v254_v27, %v253_v24 }
 0x1e7   :  { %v249_v30 = vadd.f32 %v248_v28, %v247_v26  ;;  %v256_v31 = vrot.slane %v255_v29, 2 }
 0x1e9   :  { %v250_v32 = vrot.slane %v249_v30, 1  ;;  %v257_v33 = vadd.f32 %v256_v31, %v255_v29  ;;  %v32_v29 = vld [vmem:[%s1087_s2 + $0x4] sm:$0x1] }
 0x1eb   :  { %v251_v34 = vadd.f32 %v250_v32, %v249_v30  ;;  %v258_v35 = vrot.slane %v257_v33, 1  ;;  %v33_v32 = vld [vmem:[%s1087_s2 + $0x5] sm:$0x1] }
 0x1ed   :  { %v252_v36 = vmul.f32 0.125, %v251_v34  ;;  %v259_v37 = vadd.f32 %v258_v35, %v257_v33 }
 0x1ef   :  { %v260_v38 = vmul.f32 0.125, %v259_v37  ;;  %v261_v39 = vmul.f32 %v252_v36, %v252_v36 }
 0x1f1   :  { %v262_v40 = vsub.f32 %v260_v38, %v261_v39 }
 0x1f3   :  { %v263_v41 = vmax.f32 %v262_v40, 0.0  ;;  %v539_v40 = vld [vmem:[#allocation2 + $0x278] sm:$0xff] }
 0x1f5   :  { %v264_v42 = vadd.f32 1e-05, %v263_v41  ;;  %v538_v41 = vld [vmem:[#allocation2 + $0x270] sm:$0xff] }
 0x1f7   :  { %889 = vrsqrt.f32 %v264_v42  ;;  %v537_v42 = vld [vmem:[#allocation2 + $0x268] sm:$0xff] }
 0x204   :  { %v890_v44 = vpop.eup %889 }
 0x205   :  { %v266_v45 = vmul.f32 %v890_v44, %v30_v43  ;;  %v536_v43 = vld [vmem:[#allocation2 + $0x260] sm:$0xff]  ;;  %v535_v44 = vld [vmem:[#allocation2 + $0x258] sm:$0xff] }
 0x207   :  { %v270_v47 = vrot.slane %v266_v45, %v991_v58  ;;  %v272_v48 = vmul.f32 %v266_v45, %v252_v36  ;;  %v534_v45 = vld [vmem:[#allocation2 + $0x250] sm:$0xff] }
 0x209   :  { %v273_v49 = vsub.f32 %v31_v46, %v272_v48  ;;  %v271_v50 = vmul.f32 %v270_v47, %v242_v22  ;;  %v533_v46 = vld [vmem:[#allocation2 + $0x248] sm:$0xff]  ;;  %v532_v47 = vld [vmem:[#allocation2 + $0x240] sm:$0xff]  ;;  %v531_v48 = vld [vmem:[#allocation2 + $0x238] sm:$0xff] }
 0x20b   :  { %v277_v51 = vrot.slane %v273_v49, %v991_v58  ;;  %v530_v49 = vld [vmem:[#allocation2 + $0x230] sm:$0xff] }
 0x20d   :  { %v1024_v52 = vadd.f32 %v277_v51, %v271_v50  ;;  %v529_v50 = vld [vmem:[#allocation2 + $0x228] sm:$0xff]  ;;  %v528_v51 = vld [vmem:[#allocation2 + $0x220] sm:$0xff] }
 0x20f   :  { %v279_v53 = vmax.f32 %v1024_v52, 0.0 }
 0x211   :  { %810 = vmatmul.mubr.f32.vlgmr.msra.gmra.mxu0 %v279_v53 }
 0x212   :  { %879 = vmatprep.mubr.msk.f32.mxu0 %vm921_vm0, %v920_v0  ;;  %848 = vmatpush3.msra.mxu0 %v539_v40 }
 0x213   :  { %849 = vmatprep.subr.mxu0 %v920_v0 }
 0x214   :  { %850 = vmatpush3.msra.mxu0 %v538_v41 }
 0x215   :  { %851 = vmatprep.subr.mxu0 %v920_v0 }
 0x216   :  { %852 = vmatpush3.msra.mxu0 %v537_v42 }
 0x217   :  { %853 = vmatprep.subr.mxu0 %v920_v0 }
 0x218   :  { %854 = vmatpush3.msra.mxu0 %v536_v43 }
 0x219   :  { %855 = vmatprep.subr.mxu0 %v920_v0 }
 0x21a   :  { %856 = vmatpush3.msra.mxu0 %v535_v44 }
 0x21b   :  { %857 = vmatprep.subr.mxu0 %v920_v0 }
 0x21c   :  { %858 = vmatpush3.msra.mxu0 %v534_v45 }
 0x21d   :  { %859 = vmatprep.subr.mxu0 %v920_v0 }
 0x21e   :  { %860 = vmatpush3.msra.mxu0 %v533_v46 }
 0x21f   :  { %861 = vmatprep.subr.mxu0 %v920_v0 }
 0x220   :  { %862 = vmatpush3.msra.mxu0 %v532_v47 }
 0x221   :  { %863 = vmatprep.subr.mxu0 %v920_v0 }
 0x222   :  { %864 = vmatpush3.msra.mxu0 %v531_v48 }
 0x223   :  { %865 = vmatprep.subr.mxu0 %v920_v0 }
 0x224   :  { %866 = vmatpush3.msra.mxu0 %v530_v49 }
 0x225   :  { %867 = vmatprep.subr.mxu0 %v920_v0 }
 0x226   :  { %868 = vmatpush3.msra.mxu0 %v529_v50 }
 0x227   :  { %869 = vmatprep.subr.mxu0 %v920_v0 }
 0x228   :  { %870 = vmatpush3.msra.mxu0 %v528_v51 }
 0x229   :  { %871 = vmatprep.subr.mxu0 %v920_v0 }
 0x22a   :  { %872 = vmatpush3.msra.mxu0 %v527_v54 }
 0x22b   :  { %873 = vmatprep.subr.mxu0 %v920_v0 }
 0x22c   :  { %874 = vmatpush3.msra.mxu0 %v526_v55 }
 0x22d   :  { %875 = vmatprep.subr.mxu0 %v920_v0 }
 0x22e   :  { %876 = vmatpush3.msra.mxu0 %v525_v56 }
 0x22f   :  { %877 = vmatprep.subr.mxu0 %v920_v0 }
 0x230   :  { %878 = vmatpush3.msra.mxu0 %v524_v57 }
 0x2d1   :  { %v363_v8 = vpop.f32.mrf.mxu0 }
 0x2d2   :  { %v367_v9 = vrot.slane %v363_v8, 4  ;;  %v374_v10 = vmul.f32 %v363_v8, %v363_v8 }
 0x2d3   :  { %v811_v11 = vpop.f32.mrf.mxu0 }
 0x2d4   :  { %v368_v12 = vadd.f32 %v367_v9, %v363_v8  ;;  %v375_v13 = vrot.slane %v374_v10, 4 }
 0x2d6   :  { %v369_v14 = vrot.slane %v368_v12, 2  ;;  %v376_v15 = vadd.f32 %v375_v13, %v374_v10 }
 0x2d8   :  { %v370_v16 = vadd.f32 %v369_v14, %v368_v12  ;;  %v377_v17 = vrot.slane %v376_v15, 2 }
 0x2da   :  { %v371_v18 = vrot.slane %v370_v16, 1  ;;  %v378_v19 = vadd.f32 %v377_v17, %v376_v15 }
 0x2dc   :  { %v372_v20 = vadd.f32 %v371_v18, %v370_v16  ;;  %v379_v21 = vrot.slane %v378_v19, 1  ;;  %v34_v16 = vld [vmem:[%s1087_s2 + $0x6] sm:$0x1] }
 0x2de   :  { %v373_v22 = vmul.f32 0.125, %v372_v20  ;;  %v380_v23 = vadd.f32 %v379_v21, %v378_v19  ;;  %v35_v19 = vld [vmem:[%s1087_s2 + $0x7] sm:$0x1] }
 0x2e0   :  { %v381_v24 = vmul.f32 0.125, %v380_v23  ;;  %v382_v25 = vmul.f32 %v373_v22, %v373_v22 }
 0x2e2   :  { %v383_v26 = vsub.f32 %v381_v24, %v382_v25 }
 0x2e4   :  { %v384_v27 = vmax.f32 %v383_v26, 0.0 }
 0x2e6   :  { %v385_v28 = vadd.f32 1e-05, %v384_v27 }
 0x2e8   :  { %891 = vrsqrt.f32 %v385_v28  ;;  %v621_v28 = vld [vmem:[%s1087_s2 + $0x8] ss:$0 sm:$0xff] }
 0x2f5   :  { %v892_v30 = vpop.eup %891 }
 0x2f6   :  { %v387_v31 = vmul.f32 %v892_v30, %v32_v29 }
 0x2f8   :  { %v391_v33 = vrot.slane %v387_v31, %v991_v58  ;;  %v393_v34 = vmul.f32 %v387_v31, %v373_v22 }
 0x2fa   :  { %v394_v35 = vsub.f32 %v33_v32, %v393_v34  ;;  %v392_v36 = vmul.f32 %v391_v33, %v363_v8 }
 0x2fc   :  { %v398_v37 = vrot.slane %v394_v35, %v991_v58 }
 0x2fe   :  { %v399_v38 = vadd.f32 %v398_v37, %v392_v36 }
 0x300   :  { %v400_v39 = vmax.f32 %v399_v38, 0.0 }
 0x302   :  { %845 = vmatmul.mubr.f32.vlgmr.msra.gmra.mxu1 %v400_v39 }
 0x3c2   :  { %v484_v59 = vpop.f32.mrf.mxu1 }
 0x3c3   :  { %v488_v60 = vrot.slane %v484_v59, 4  ;;  %v495_v61 = vmul.f32 %v484_v59, %v484_v59 }
 0x3c4   :  { %v846_v62 = vpop.f32.mrf.mxu1 }
 0x3c5   :  { %v489_v63 = vadd.f32 %v488_v60, %v484_v59  ;;  %v496_v1 = vrot.slane %v495_v61, 4 }
 0x3c7   :  { %v490_v2 = vrot.slane %v489_v63, 2  ;;  %v497_v3 = vadd.f32 %v496_v1, %v495_v61 }
 0x3c9   :  { %v491_v4 = vadd.f32 %v490_v2, %v489_v63  ;;  %v498_v5 = vrot.slane %v497_v3, 2 }
 0x3cb   :  { %v492_v6 = vrot.slane %v491_v4, 1  ;;  %v499_v7 = vadd.f32 %v498_v5, %v497_v3 }
 0x3cd   :  { %v493_v8 = vadd.f32 %v492_v6, %v491_v4  ;;  %v500_v9 = vrot.slane %v499_v7, 1 }
 0x3cf   :  { %v494_v10 = vmul.f32 0.125, %v493_v8  ;;  %v501_v11 = vadd.f32 %v500_v9, %v499_v7 }
 0x3d1   :  { %v502_v12 = vmul.f32 0.125, %v501_v11  ;;  %v503_v13 = vmul.f32 %v494_v10, %v494_v10 }
 0x3d3   :  { %v504_v0 = vsub.f32 %v502_v12, %v503_v13 }
 0x3d5   :  { %v505_v14 = vmax.f32 %v504_v0, 0.0 }
 0x3d7   :  { %v506_v15 = vadd.f32 1e-05, %v505_v14 }
 0x3d9   :  { %893 = vrsqrt.f32 %v506_v15 }
 0x3e6   :  { %v894_v17 = vpop.eup %893 }
 0x3e7   :  { %v508_v18 = vmul.f32 %v894_v17, %v34_v16 }
 0x3e9   :  { %v512_v20 = vrot.slane %v508_v18, %v991_v58  ;;  %v514_v21 = vmul.f32 %v508_v18, %v494_v10 }
 0x3eb   :  { %v515_v22 = vsub.f32 %v35_v19, %v514_v21  ;;  %v513_v23 = vmul.f32 %v512_v20, %v484_v59 }
 0x3ed   :  { %v519_v24 = vrot.slane %v515_v22, %v991_v58 }
 0x3ef   :  { %v520_v25 = vadd.f32 %v519_v24, %v513_v23 }
 0x3f1   :  { %v521_v26 = vadd.f32 %v520_v25, %v279_v53 }
 0x3f3   :  { %v522_v27 = vmax.f32 %v521_v26, 0.0 }
 0x3f5   :  { %880 = vmatmul.mubr.f32.vlgmr.msra.gmra.mxu0 %v522_v27 }
 0x4b5   :  { %v610_v29 = vpop.f32.mrf.mxu0 }
 0x4b6   :  { %v611_v30 = vadd.f32 %v621_v28, %v610_v29 }
 0x4b7   :  { %v881_v31 = vpop.f32.mrf.mxu0 }
 0x4b8   :  { %v614_v32 = vmax.f32 %v611_v30, 0.0 }
 0x4ba   :  { %615 = vst [vmem:[%s1088_s3] sm:$0xff] %v614_v32 }
 0x4bb   :  { %620 = vsyncpa [#allocation3], 1 }

</bundles_post_ra>
